<compile_context>
chip_gen: v7x
topology: tpu7x:2x2x1
jax: 0.10.0
libtpu: 0.0.40
codegen_flags: <defaults>
</compile_context>

<pallas_src>
import jax
import jax.numpy as jnp
from jax.experimental import pallas as pl
from jax.experimental.pallas import tpu as pltpu


_TARGET_BLOCK_BYTES = 6 * 1024 * 1024     # ~6 MiB blocks -> ~24 MiB resident (2 arrays x 2 bufs)
_FALLBACK_VMEM_LIMIT = 48 * 1024 * 1024   # safe on v7x (64 MiB physical VMEM)


def _copy_kernel(x_ref, o_ref):
    # Pure dense VMEM copy; the channel shuffle lives entirely in the BlockSpec
    # index maps (i.e. in the DMA addressing).
    o_ref[...] = x_ref[...]


def _vmem_limit_bytes():
    # ~75% of physical VMEM: 48 MiB on v7x (64 MiB), 96 MiB on v5e/v6e (128 MiB).
    try:
        cap = pltpu.get_tpu_info().vmem_capacity_bytes
        return int(min(cap * 3 // 4, 112 * 1024 * 1024))
    except Exception:
        return _FALLBACK_VMEM_LIMIT


def _round_down(x, m):
    return max(m, (x // m) * m)


def _balance_batch(b, bt, tail_steps):
    """v7x shards 'parallel' grid axes over 2 TensorCores: avoid folding the
    whole batch into one block when that leaves an odd tiny grid."""
    nb = pl.cdiv(b, bt)
    if nb == 1 and b > 1 and tail_steps % 2 == 1:
        bt = pl.cdiv(b, 2)
        nb = pl.cdiv(b, bt)
    return bt, nb


def _shuffle_aligned(x4, b, groups, cpg, hw, dsize):
    """hw % 128 == 0: spatial rows on sublanes, 128 lanes; fully dense tiles."""
    rows = hw // 128
    x5 = x4.reshape(b, groups, cpg, rows, 128)

    slab = cpg * rows * 128 * dsize                       # one (batch, group) slab
    if rows <= 8 or slab <= _TARGET_BLOCK_BYTES:
        R = rows                                          # prefer full hw first
        bt = max(1, min(b, _TARGET_BLOCK_BYTES // max(slab, 1)))
    else:
        bt = 1
        R = min(rows, _round_down(_TARGET_BLOCK_BYTES // (cpg * 128 * dsize), 8))
    nr = pl.cdiv(rows, R)
    bt, nb = _balance_batch(b, bt, groups * nr)

    out = pl.pallas_call(
        _copy_kernel,
        out_shape=jax.ShapeDtypeStruct((b, cpg, groups, rows, 128), x4.dtype),
        grid=(nb, groups, nr),
        in_specs=[pl.BlockSpec((bt, None, cpg, R, 128),
                               lambda bi, gi, ri: (bi, gi, 0, ri, 0))],
        out_specs=pl.BlockSpec((bt, cpg, None, R, 128),
                               lambda bi, gi, ri: (bi, 0, gi, ri, 0)),
        compiler_params=pltpu.CompilerParams(
            dimension_semantics=("parallel", "parallel", "parallel"),
            vmem_limit_bytes=_vmem_limit_bytes()),
    )(x5)
    return out


def _shuffle_general(x4, b, groups, cpg, hw, dsize):
    """Any hw (the real ShuffleNet hot path, e.g. 56x56/28x28/14x14): same
    copy-by-DMA-addressing scheme on the 4-D view; prefer T == hw so each
    (batch, group) read is one contiguous cpg*hw run."""
    sub = max(8, 32 // dsize)                             # sublane packing (f32:8, bf16:16)
    pad_cpg = pl.cdiv(cpg, sub) * sub
    pad_hw = pl.cdiv(hw, 128) * 128
    slab = pad_cpg * pad_hw * dsize                       # VMEM-padded (batch, group) slab

    if slab <= _TARGET_BLOCK_BYTES:
        T = hw                                            # full spatial extent
        bt = max(1, min(b, _TARGET_BLOCK_BYTES // slab))
    else:
        bt = 1
        T = _round_down(_TARGET_BLOCK_BYTES // (pad_cpg * dsize), 128)
        T = hw if T >= hw else T
    nt = pl.cdiv(hw, T)
    bt, nb = _balance_batch(b, bt, groups * nt)

    out = pl.pallas_call(
        _copy_kernel,
        out_shape=jax.ShapeDtypeStruct((b, cpg, groups, hw), x4.dtype),
        grid=(nb, groups, nt),
        in_specs=[pl.BlockSpec((bt, None, cpg, T),
                               lambda bi, gi, ti: (bi, gi, 0, ti))],
        out_specs=pl.BlockSpec((bt, cpg, None, T),
                               lambda bi, gi, ti: (bi, 0, gi, ti)),
        compiler_params=pltpu.CompilerParams(
            dimension_semantics=("parallel", "parallel", "parallel"),
            vmem_limit_bytes=_vmem_limit_bytes()),
    )(x4)
    return out


def _shuffle_general_fallback(x4, b, groups, cpg, hw, dsize):
    """Strictly (8,128)/full-dim compliant fallback (full-group blocks, axis
    swap in registers).  Only used if the primary general path fails to lower."""
    sub = max(8, 32 // dsize)
    pad_cpg = pl.cdiv(cpg, sub) * sub
    pad_hw = pl.cdiv(hw, 128) * 128
    slab = groups * pad_cpg * pad_hw * dsize
    if slab <= _TARGET_BLOCK_BYTES:
        T = hw
        bt = max(1, min(b, _TARGET_BLOCK_BYTES // slab))
    else:
        bt = 1
        T = _round_down(_TARGET_BLOCK_BYTES // (groups * pad_cpg * dsize), 128)
        T = hw if T >= hw else T
    nt = pl.cdiv(hw, T)
    nb = pl.cdiv(b, bt)

    def swap_kernel(x_ref, o_ref):
        o_ref[...] = jnp.swapaxes(x_ref[...], 1, 2)

    return pl.pallas_call(
        swap_kernel,
        out_shape=jax.ShapeDtypeStruct((b, cpg, groups, hw), x4.dtype),
        grid=(nb, nt),
        in_specs=[pl.BlockSpec((bt, groups, cpg, T), lambda bi, ti: (bi, 0, 0, ti))],
        out_specs=pl.BlockSpec((bt, cpg, groups, T), lambda bi, ti: (bi, 0, 0, ti)),
        compiler_params=pltpu.CompilerParams(
            dimension_semantics=("parallel", "parallel"),
            vmem_limit_bytes=_vmem_limit_bytes()),
    )(x4)


def channel_shuffle(x, groups):
    """Pallas implementation of ShuffleModule.forward (x is NCHW)."""
    b, n, h, w = x.shape
    assert n % groups == 0, "channels must be divisible by groups"
    if groups == 1:
        return x  # shuffle is the identity
    cpg = n // groups
    hw = h * w
    dsize = x.dtype.itemsize

    # Free view: channels split into (groups, cpg); spatial axis flattened.
    x4 = x.reshape(b, groups, cpg, hw)

    if hw % 128 == 0:
        out = _shuffle_aligned(x4, b, groups, cpg, hw, dsize)
    else:
        try:
            out = _shuffle_general(x4, b, groups, cpg, hw, dsize)
        except Exception:
            out = _shuffle_general_fallback(x4, b, groups, cpg, hw, dsize)

    # (b, cpg, groups, ...) -> (b, n, h, w): contiguous reshape, free.
    return out.reshape(b, n, h, w)


def channel_shuffle_ref(x, groups):
    """Pure-JAX reference mirroring the PyTorch code exactly."""
    b, n, h, w = x.shape
    x = x.reshape(b, groups, n // groups, h, w)
    x = jnp.transpose(x, (0, 2, 1, 3, 4))
    return x.reshape(b, n, h, w)


if __name__ == "__main__":
    key = jax.random.PRNGKey(0)

    # 1) Spec shape: batch=2, channels=4, 16x16 spatial, groups=2 (aligned path).
    x = jax.random.normal(key, (2, 4, 16, 16), dtype=jnp.float32)
    out = jax.block_until_ready(channel_shuffle(x, 2))
    ref = channel_shuffle_ref(x, 2)
    assert out.shape == ref.shape and out.dtype == x.dtype
    assert jnp.array_equal(out, ref), "mismatch (2,4,16,16) g=2"

    # 2) Real ShuffleNet-style non-128-aligned spatial size (general path).
    x2 = jax.random.normal(key, (2, 48, 28, 28), dtype=jnp.float32)
    out2 = jax.block_until_ready(channel_shuffle(x2, 3))
    assert jnp.array_equal(out2, channel_shuffle_ref(x2, 3)), "mismatch (2,48,28,28) g=3"

    # 3) 56x56, small channel count (general path, small cpg).
    x3 = jax.random.normal(key, (1, 12, 56, 56), dtype=jnp.float32)
    out3 = jax.block_until_ready(channel_shuffle(x3, 2))
    assert jnp.array_equal(out3, channel_shuffle_ref(x3, 2)), "mismatch (1,12,56,56) g=2"

    # 4) bf16, 14x14 (general path, packed dtype).
    x4 = jax.random.normal(key, (2, 24, 14, 14), dtype=jnp.bfloat16)
    out4 = jax.block_until_ready(channel_shuffle(x4, 3))
    assert jnp.array_equal(out4, channel_shuffle_ref(x4, 3)), "mismatch (2,24,14,14) g=3 bf16"

    print("KERNEL_OK")
</pallas_src>

<mosaic_0001>
module attributes {stable_mosaic.version = 11 : i64} {
  func.func @_copy_kernel(%arg0: i32, %arg1: i32, %arg2: i32, %arg3: memref<2x1x2x2x128xf32, #tpu.memory_space<vmem>>, %arg4: memref<2x2x1x2x128xf32, #tpu.memory_space<vmem>>) attributes {dimension_semantics = [#tpu.dimension_semantics<parallel>, #tpu.dimension_semantics<parallel>, #tpu.dimension_semantics<parallel>], iteration_bounds = array<i64: 1, 2, 1>, scalar_prefetch = 0 : i64, scratch_operands = 0 : i64, tpu.core_type = #tpu.core_type<tc>, window_params = [{transform_indices = @transform_0, window_bounds = array<i64: 2, 1, 2, 2, 128>}, {transform_indices = @transform_1, window_bounds = array<i64: 2, 2, 1, 2, 128>}]} {
    %c0 = arith.constant 0 : index
    %c0_0 = arith.constant 0 : index
    %c0_1 = arith.constant 0 : index
    %c0_2 = arith.constant 0 : index
    %c0_3 = arith.constant 0 : index
    %0 = vector.load %arg3[%c0, %c0_0, %c0_1, %c0_2, %c0_3] : memref<2x1x2x2x128xf32, #tpu.memory_space<vmem>>, vector<2x1x2x2x128xf32>
    %1 = vector.shape_cast %0 : vector<2x1x2x2x128xf32> to vector<2x2x2x128xf32>
    %c0_4 = arith.constant 0 : index
    %c0_5 = arith.constant 0 : index
    %c0_6 = arith.constant 0 : index
    %c0_7 = arith.constant 0 : index
    %c0_8 = arith.constant 0 : index
    %2 = vector.load %arg4[%c0_4, %c0_5, %c0_6, %c0_7, %c0_8] : memref<2x2x1x2x128xf32, #tpu.memory_space<vmem>>, vector<2x2x1x2x128xf32>
    %3 = vector.shape_cast %2 : vector<2x2x1x2x128xf32> to vector<2x2x2x128xf32>
    %4 = vector.shape_cast %1 : vector<2x2x2x128xf32> to vector<2x2x1x2x128xf32>
    tpu.vector_store %arg4[%c0_4, %c0_5, %c0_6, %c0_7, %c0_8], %4 {strides = array<i32>} : memref<2x2x1x2x128xf32, #tpu.memory_space<vmem>>, vector<2x2x1x2x128xf32>,
    return
  }
  func.func @transform_0(%arg0: i32, %arg1: i32, %arg2: i32) -> (i32, i32, i32, i32, i32) {
    %c0_i32 = arith.constant 0 : i32
    %c0_i32_0 = arith.constant 0 : i32
    %c0_i32_1 = arith.constant 0 : i32
    return %arg0, %arg1, %c0_i32, %arg2, %c0_i32_0 : i32, i32, i32, i32, i32
  }
  func.func @transform_1(%arg0: i32, %arg1: i32, %arg2: i32) -> (i32, i32, i32, i32, i32) {
    %c0_i32 = arith.constant 0 : i32
    %c0_i32_0 = arith.constant 0 : i32
    %c0_i32_1 = arith.constant 0 : i32
    return %arg0, %c0_i32, %arg1, %arg2, %c0_i32_0 : i32, i32, i32, i32, i32
  }
}

</mosaic_0001>

<bundles_post_ra>
// kernel: tpu_custom_call.1
= control target key start
LH: loop header
LB: loop body
LE: loop exit
PB: predicated region body
PF: predicated region fallthrough
CT: control target
= control target key end

     0   :  { %6 = vsyncpa [#allocation3], 0  ;;  %s653_s0 = inlined_call_operand.hbm [shape: f32[2,2,2,2,128], index: 0, kind: input, shape index: {}]   ;;  %s654_s1 = inlined_call_operand.hbm [shape: f32[2,2,2,2,128], index: 1, kind: output, shape index: {}]  }
   0x1   :  { %8 = vsyncpa [#allocation3 + $0x1], 0 }
   0x2   :  { %9 = vsyncpa [#allocation4], 0 }
   0x3   :  { %11 = vsyncpa [#allocation4 + $0x1], 0  ;;  %s501_s6 = smov 0   ;;  %s503_s7 = smov 0  }
   0x4   :  { %s505_s8 = smov 0   ;;  %s507_s9 = smov 0  }
   0x5   :  { %s509_s10 = smov 0   ;;  %s511_s11 = smov 0  }
   0x6 LB: > { %s309_s12 = sadd.s32 4294967295, %s480_s11   ;;  %s310_s13 = sadd.s32 4294967294, %s480_s11   ;;  %s480_s11 = sphi %s511_s11, %s17_s11   ;;  %s476_s10 = sphi %s509_s10, %s663_s10   ;;  %s472_s9 = sphi %s507_s9, %s662_s9   ;;  %s468_s8 = sphi %s505_s8, %s661_s8   ;;  %s464_s7 = sphi %s503_s7, %s660_s7   ;;  %s460_s6 = sphi %s501_s6, %s659_s6  }
   0x7   : > { %s32_s14 = sadd.s32 1, %s476_s10  ;;  %s47_s15 = sadd.s32 1, %s468_s8 }
   0x8   : > { %p34_p0 = scmp.ge.s32.totalorder %s32_s14, 2  ;;  %p54_p1 = scmp.ne.s32.totalorder %s468_s8, %s464_s7 }
   0x9   : > { %p55_p2 = scmp.eq.s32.totalorder %s480_s11, 0  ;;  %p60_p3 = scmp.ne.s32.totalorder %s464_s7, %s460_s6 }
   0xa   : > { %s665_s14 = smov (%p34_p0, %s32_s14), 0  ;;  %p61_p5 = scmp.eq.s32.totalorder %s309_s12, 0 }
   0xb   : > { %p542_p4 = por %p55_p2, %p54_p1  ;;  %s41_s17 = ssub.s32 %s476_s10, %s665_s14 }
   0xc   : > { %p88_p6 = scmp.eq.s32.totalorder %s309_s12, 1  ;;  %p45_p7 = scmp.eq.s32.totalorder %s41_s17, 0 }
   0xd   : > { %p548_p8 = por %p61_p5, %p60_p3  ;;  %p94_p10 = scmp.eq.s32.totalorder %s310_s13, 1 }
   0xe   : > { %p552_p9 = por %p88_p6, %p54_p1  ;;  %p312_p12 = scmp.ge.s32.totalorder %s480_s11, 2 }
   0xf   : > { %s557_s20 = scalar_select %p45_p7, %s468_s8, %s47_s15  }
  0x10   : > { %p559_p11 = por %p94_p10, %p60_p3  ;;  %110 = sbr.rel (%p312_p12) target bundleno = 36 (0x24), region = 16 }
  0x17   : > { %s114_s22 = sand.u32 1, %s468_s8   ;;  %s325_s24 = sshll.u32 %s476_s10, 6 }
  0x18   : > { %s313_s23 = sshll.u32 %s114_s22, 3  ;;  %s128_s28 = scalar_lea.hbm %s653_s0, %s325_s24 }
  0x19   : > { %s326_s25 = scalar_select %p542_p4, [#allocation0], [#allocation8] }
  0x1a   : > { %s118_s30 = scalar_lea.vmem [#allocation2], %s313_s23  ;;  %s482_s3 = smov 128  }
  0x1b   : > { %s133_s29 = sld [smem:[%s326_s25]]   ;;  %s141_s2 = sshll.u32 %s118_s30, 4  ;;  %s142_s2 = int_to_ptr.vmem [resolvable:$true] %s141_s2 }
  0x1c   : > { %327 = sst [smem:[#allocation7]] (%p542_p4), %s482_s3  ;;  %s483_s4 = smov 64  }
  0x1d   : > { %328 = sst [smem:[#allocation7 + $0x1]] (%p542_p4), %s483_s4  ;;  %s484_s5 = smov 2  }
  0x1e   : > { %329 = sst [smem:[#allocation7 + $0x2]] (%p542_p4), %s484_s5  ;;  %s485_s12 = smov 32  }
  0x1f   : > { %330 = sst [smem:[#allocation7 + $0x3]] (%p542_p4), %s485_s12  ;;  %s115_s17 = scalar_lea.sflag [#allocation3], %s114_s22 }
  0x20   : > { %331 = sst [smem:[#allocation7 + $0x4]] (%p542_p4), %s485_s12  ;;  %s486_s23 = smov [#allocation6]  }
  0x21   : > { %s316_s13 = sshll.u32 %s133_s29, 26  ;;  %332 = sst [smem:[#allocation7 + $0x5]] (%p542_p4), %s484_s5 }
  0x22   : > { %s317_s15 = sadd.s32 134217728, %s316_s13 }
  0x23   : > { %333 = dma.general (%p542_p4), %s128_s28, 128, %s142_s2, %s115_s17, %s486_s23, [#allocation7], %s317_s15, 0  }
  0x24 PF: > { %p318_p13 = scmp.ge.s32.totalorder %s480_s11, 1  ;;  %p162_p0 = scmp.lt.s32.totalorder %s480_s11, 3 }
  0x26   : > { %p163_p1 = pnand %p318_p13, %p162_p0 }
  0x27   : > { %s590_s24 = sand.u32 (!%p163_p1), 1, %s464_s7  }
  0x28   : > { %166 = sbr.rel (%p163_p1) target bundleno = 75 (0x4b), region = 24  ;;  %s319_s25 = sshll.u32 (!%p163_p1), %s590_s24, 3 }
  0x29   : > { %s169_s26 = scalar_lea.sflag (!%p163_p1), [#allocation3], %s590_s24  ;;  %s172_s27 = scalar_lea.vmem (!%p163_p1), [#allocation2], %s319_s25 }
  0x2f   : > { %451 = dma.done.wait (%p548_p8), %s169_s26, 128  }
  0x30   : > { %453 = vsyncadd (%p548_p8), %s169_s26, 4294967168  ;;  %s190_s16 = scalar_lea.vmem [#allocation5], %s319_s25  ;;  %s322_s28 = sshll.u32 %s472_s9, 5  ;;  %v193_v0 = vld [vmem:[%s172_s27] sm:$0xff]  }
  0x31   : > { %s218_s22 = sshll.u32 %s190_s16, 4  ;;  %s604_s2 = scalar_lea.hbm %s654_s1, %s322_s28  ;;  %197 = vst [vmem:[%s190_s16] sm:$0xff] %v193_v0   ;;  %s599_s22 = int_to_ptr.vmem [resolvable:$true] %s218_s22 }
  0x32   : > { %s202_s18 = scalar_lea.sflag [#allocation4], %s590_s24  ;;  %s398_s3 = scalar_lea.vmem %s599_s22, 128 }
  0x33   : > { %p399_p2 = scmp.ne.s32.totalorder %s599_s22, %s398_s3  ;;  %s487_s4 = smov [#allocation5]  }
  0x34   : > { %s402_s9 = sshll.u32 %s487_s4, 4  ;;  %s403_s9 = int_to_ptr.vmem [resolvable:$false] %s402_s9 }
  0x35   : > { %p400_p3 = pnand %p399_p2, %p552_p9  ;;  %s404_s5 = scalar_lea.vmem %s403_s9, 256 }
  0x36   : > { %p405_p5 = scmp.lt.s32.totalorder %s599_s22, %s403_s9  ;;  %p406_p6 = scmp.lt.s32.totalorder %s404_s5, %s398_s3 }
  0x37   : > { %p401_p4 = pneg %p400_p3 }
  0x38   : > { %p407_p7 = por %p406_p6, %p405_p5 }
  0x3a   : > { %p408_p8 = pnand %p407_p7, %p401_p4 }
  0x3c   : > { %411 = shalt.err (!%p408_p8)
}
  0x3d   : > { %s412_s12 = scalar_lea.hbm %s604_s2, 128  ;;  %s416_s17 = scalar_lea.hbm %s654_s1, 256 }
  0x3e   : > { %p413_p10 = scmp.ne.s32.totalorder %s604_s2, %s412_s12  ;;  %p417_p1 = scmp.lt.u32.totalorder %s604_s2, %s654_s1 }
  0x3f   : > { %p418_p2 = scmp.lt.u32.totalorder %s416_s17, %s412_s12  ;;  %p420_p4 = scmp.lt.u32.totalorder %s412_s12, %s604_s2 }
  0x40   : > { %p414_p13 = pnand %p413_p10, %p552_p9 }
  0x41   : > { %p419_p3 = por %p418_p2, %p417_p1 }
  0x42   : > { %p415_p0 = pneg %p414_p13 }
  0x43   : > { %p421_p5 = por %p420_p4, %p419_p3 }
  0x45   : > { %p422_p6 = pnand %p421_p5, %p415_p0 }
  0x47   : > { %425 = shalt.err (!%p422_p6)
}
  0x48   : > { %s488_s26 = smov 32   ;;  %s489_s27 = smov 64  }
  0x49   : > { %s490_s16 = smov 2  }
  0x4a   : > { %335 = dma.vmem_to_hbm [thread:$0]  (%p552_p9), %s599_s22, 128, %s604_s2, %s202_s18, %s488_s26, %s489_s27, %s490_s16  }
  0x4b PF: > { %s233_s28 = sand.u32 1, %s460_s6   ;;  %p338_p7 = pnand %p312_p12, %p559_p11 }
  0x4c   : > { %s234_s29 = scalar_lea.sflag [#allocation4], %s233_s28 }
  0x4d   : > { %455 = dma.done.wait (!%p338_p7), %s234_s29, 128  }
  0x4e   : > { %457 = vsyncadd (!%p338_p7), %s234_s29, 4294967168  ;;  %s17_s11 = sadd.s32 1, %s480_s11   ;;  %s659_s6 = smov %s464_s7 }
  0x4f   : > { %p14_p8 = scmp.ge.s32.totalorder %s17_s11, 4   ;;  %s660_s7 = smov %s468_s8 }
  0x50   : > { %s661_s8 = smov %s557_s20  ;;  %s662_s9 = smov %s476_s10 }
  0x51   : > { %s663_s10 = smov %s665_s14  ;;  %16 = sbr.rel (!%p14_p8) target bundleno = 6 (0x6), region = 74 }
  0x58   :  { %239 = vsyncpa [#allocation3], 1 }
  0x59   :  { %241 = vsyncpa [#allocation3 + $0x1], 1 }
  0x5a   :  { %242 = vsyncpa [#allocation4], 1 }
  0x5b   :  { %244 = vsyncpa [#allocation4 + $0x1], 1 }

</bundles_post_ra>
